<compile_context>
chip_gen: v5e
topology: v5e:2x2
jax: 0.10.0
libtpu: 0.0.40
codegen_flags: <defaults>
</compile_context>

<pallas_src>
import functools

import jax
import jax.numpy as jnp
from jax import lax
from jax.experimental import pallas as pl
from jax.experimental.pallas import tpu as pltpu


def _attention_single_kv_kernel(q_ref, k_ref, v_ref, o_ref, *, scale):
    """Whole K/V row in one tile: plain stable softmax, no scratch state."""
    q = q_ref[0]                                    # (tq, D)
    k = k_ref[0]                                    # (Lk, D)
    v = v_ref[0]                                    # (Lk, Dv)

    # Fold the softmax scale into Q (cheaper than scaling the (tq, Lk) scores).
    qs = q * jnp.asarray(scale, dtype=q.dtype)

    # Scores: contract last dims directly (no k.T / XLU transpose).
    s = lax.dot_general(
        qs, k,
        dimension_numbers=(((1,), (1,)), ((), ())),
        preferred_element_type=jnp.float32,
    )                                               # (tq, Lk) f32

    m = jnp.max(s, axis=-1, keepdims=True)          # (tq, 1)
    p = jnp.exp(s - m)                              # (tq, Lk) f32
    l = jnp.sum(p, axis=-1, keepdims=True)          # (tq, 1)

    acc = lax.dot_general(
        p.astype(v.dtype), v,
        dimension_numbers=(((1,), (0,)), ((), ())),
        preferred_element_type=jnp.float32,
    )                                               # (tq, Dv) f32

    inv_l = pl.reciprocal(l, approx=True)
    o_ref[0] = (acc * inv_l).astype(o_ref.dtype)


def _flash_attention_kernel(q_ref, k_ref, v_ref, o_ref,
                            m_sc, l_sc, acc_sc, *, scale):
    """Multi-kv-tile online-softmax (flash) kernel."""
    kv = pl.program_id(2)

    # --- init accumulator state on the first kv tile -------------------------
    @pl.when(kv == 0)
    def _():
        m_sc[...] = jnp.full_like(m_sc, -jnp.inf)
        l_sc[...] = jnp.zeros_like(l_sc)
        acc_sc[...] = jnp.zeros_like(acc_sc)

    # Native-dtype tiles; f32 accumulation happens inside the MXU.
    q = q_ref[0]                                    # (tq, D)
    k = k_ref[0]                                    # (tk, D)
    v = v_ref[0]                                    # (tk, Dv)

    # Fold the softmax scale into Q (touches tq*D, not tq*tk elements).
    qs = q * jnp.asarray(scale, dtype=q.dtype)

    # Scores: contract last dims directly (no k.T / XLU transpose).
    s = lax.dot_general(
        qs, k,
        dimension_numbers=(((1,), (1,)), ((), ())),
        preferred_element_type=jnp.float32,
    )                                               # (tq, tk) f32

    # --- online softmax update -----------------------------------------------
    m_prev = m_sc[...]                              # (tq, 1)
    m_new = jnp.maximum(m_prev, jnp.max(s, axis=-1, keepdims=True))
    alpha = jnp.exp(m_prev - m_new)                 # rescale of old state
    p = jnp.exp(s - m_new)                          # (tq, tk) f32

    l_sc[...] = alpha * l_sc[...] + jnp.sum(p, axis=-1, keepdims=True)
    acc_sc[...] = alpha * acc_sc[...] + lax.dot_general(
        p.astype(v.dtype), v,
        dimension_numbers=(((1,), (0,)), ((), ())),
        preferred_element_type=jnp.float32,
    )                                               # (tq, Dv) f32
    m_sc[...] = m_new

    # --- finalize on the last kv tile -----------------------------------------
    @pl.when(kv == pl.num_programs(2) - 1)
    def _():
        inv_l = pl.reciprocal(l_sc[...], approx=True)
        o_ref[0] = (acc_sc[...] * inv_l).astype(o_ref.dtype)


def attention(Q, K, V, dk=128, *, q_tile=256, kv_tile=512,
              vmem_limit_bytes=48 * 1024 * 1024):
    """Pallas TPU implementation of Attention.forward(Q, K, V, dk)."""
    B, Lq, D = Q.shape
    Bk, Lk, Dk = K.shape
    Bv, Lkv, Dv = V.shape
    assert B == Bk == Bv and D == Dk and Lk == Lkv

    # Tile selection: sized for the v7x 64 MiB VMEM ceiling (q<=256, kv<=512);
    # fall back to the full extent when the sequence doesn't tile evenly or is
    # shorter than a tile (full-extent blocks are always legal).
    tq = min(q_tile, Lq)
    if Lq % tq != 0 or (tq != Lq and tq % 8 != 0):
        tq = Lq
    tk = min(kv_tile, Lk)
    if Lk % tk != 0 or (tk != Lk and tk % 8 != 0):
        tk = Lk

    # TODO(synk): for Dv < 128 (small head dims) the output store is not
    # lane-dense; fold heads/batch into the last dim for production shapes.

    scale = 1.0 / float(dk) ** 0.5
    compiler_params_kwargs = dict(vmem_limit_bytes=vmem_limit_bytes)

    if Lk == tk:
        # Single kv tile: skip the online-softmax machinery entirely.
        kernel = functools.partial(_attention_single_kv_kernel, scale=scale)
        grid = (B, Lq // tq)
        return pl.pallas_call(
            kernel,
            out_shape=jax.ShapeDtypeStruct((B, Lq, Dv), Q.dtype),
            grid_spec=pltpu.PrefetchScalarGridSpec(
                num_scalar_prefetch=0,
                grid=grid,
                in_specs=[
                    pl.BlockSpec((1, tq, D), lambda b, qi: (b, qi, 0)),
                    pl.BlockSpec((1, tk, D), lambda b, qi: (b, 0, 0)),
                    pl.BlockSpec((1, tk, Dv), lambda b, qi: (b, 0, 0)),
                ],
                out_specs=pl.BlockSpec((1, tq, Dv), lambda b, qi: (b, qi, 0)),
            ),
            compiler_params=pltpu.CompilerParams(
                dimension_semantics=("parallel", "parallel"),
                **compiler_params_kwargs,
            ),
        )(Q, K, V)

    kernel = functools.partial(_flash_attention_kernel, scale=scale)
    grid = (B, Lq // tq, Lk // tk)
    return pl.pallas_call(
        kernel,
        out_shape=jax.ShapeDtypeStruct((B, Lq, Dv), Q.dtype),
        grid_spec=pltpu.PrefetchScalarGridSpec(
            num_scalar_prefetch=0,
            grid=grid,
            in_specs=[
                pl.BlockSpec((1, tq, D), lambda b, qi, ki: (b, qi, 0)),
                pl.BlockSpec((1, tk, D), lambda b, qi, ki: (b, ki, 0)),
                pl.BlockSpec((1, tk, Dv), lambda b, qi, ki: (b, ki, 0)),
            ],
            out_specs=pl.BlockSpec((1, tq, Dv), lambda b, qi, ki: (b, qi, 0)),
            scratch_shapes=[
                pltpu.VMEM((tq, 1), jnp.float32),    # running max m
                pltpu.VMEM((tq, 1), jnp.float32),    # running denom l
                pltpu.VMEM((tq, Dv), jnp.float32),   # output accumulator
            ],
        ),
        compiler_params=pltpu.CompilerParams(
            dimension_semantics=("parallel", "parallel", "arbitrary"),
            **compiler_params_kwargs,
        ),
    )(Q, K, V)


def _attention_ref(Q, K, V, dk=128):
    s = jnp.einsum("bqd,bkd->bqk", Q.astype(jnp.float32),
                   K.astype(jnp.float32)) / (float(dk) ** 0.5)
    p = jax.nn.softmax(s, axis=-1)
    return jnp.einsum("bqk,bkd->bqd", p, V.astype(jnp.float32)).astype(Q.dtype)


if __name__ == "__main__":
    key = jax.random.PRNGKey(0)

    # --- small shape matching the module's test scale (single-kv-tile path) --
    kq, kk, kv = jax.random.split(key, 3)
    B, Lq, Lk, D, Dv = 2, 8, 8, 32, 32
    Q = jax.random.normal(kq, (B, Lq, D), dtype=jnp.float32)
    K = jax.random.normal(kk, (B, Lk, D), dtype=jnp.float32)
    V = jax.random.normal(kv, (B, Lk, Dv), dtype=jnp.float32)

    out = jax.block_until_ready(attention(Q, K, V, dk=128))
    ref = _attention_ref(Q, K, V, dk=128)
    assert out.shape == (B, Lq, Dv)
    assert jnp.allclose(out, ref, atol=2e-3, rtol=2e-3), "mismatch (small shapes)"

    # --- larger shape to exercise the multi-kv-tile online-softmax path ------
    kq2, kk2, kv2 = jax.random.split(jax.random.PRNGKey(1), 3)
    B2, L2, D2 = 2, 256, 128
    Q2 = jax.random.normal(kq2, (B2, L2, D2), dtype=jnp.float32)
    K2 = jax.random.normal(kk2, (B2, L2, D2), dtype=jnp.float32)
    V2 = jax.random.normal(kv2, (B2, L2, D2), dtype=jnp.float32)

    out2 = jax.block_until_ready(
        attention(Q2, K2, V2, dk=128, q_tile=128, kv_tile=128))
    ref2 = _attention_ref(Q2, K2, V2, dk=128)
    assert out2.shape == (B2, L2, D2)
    assert jnp.allclose(out2, ref2, atol=2e-3, rtol=2e-3), "mismatch (tiled shapes)"

    print("KERNEL_OK")
</pallas_src>

<mosaic_0001>
module attributes {stable_mosaic.version = 11 : i64} {
  func.func @_attention_single_kv_kernel(%arg0: i32, %arg1: i32, %arg2: memref<1x8x32xf32, #tpu.memory_space<vmem>>, %arg3: memref<1x8x32xf32, #tpu.memory_space<vmem>>, %arg4: memref<1x8x32xf32, #tpu.memory_space<vmem>>, %arg5: memref<1x8x32xf32, #tpu.memory_space<vmem>>) attributes {dimension_semantics = [#tpu.dimension_semantics<parallel>, #tpu.dimension_semantics<parallel>], iteration_bounds = array<i64: 2, 1>, scalar_prefetch = 0 : i64, scratch_operands = 0 : i64, tpu.core_type = #tpu.core_type<tc>, window_params = [{transform_indices = @transform_0, window_bounds = array<i64: 1, 8, 32>}, {transform_indices = @transform_1, window_bounds = array<i64: 1, 8, 32>}, {transform_indices = @transform_2, window_bounds = array<i64: 1, 8, 32>}, {transform_indices = @transform_3, window_bounds = array<i64: 1, 8, 32>}]} {
    %c0 = arith.constant 0 : index
    %c0_0 = arith.constant 0 : index
    %c0_1 = arith.constant 0 : index
    %0 = vector.load %arg2[%c0, %c0_0, %c0_1] : memref<1x8x32xf32, #tpu.memory_space<vmem>>, vector<1x8x32xf32>
    %1 = vector.shape_cast %0 : vector<1x8x32xf32> to vector<8x32xf32>
    %c0_2 = arith.constant 0 : index
    %c0_3 = arith.constant 0 : index
    %c0_4 = arith.constant 0 : index
    %2 = vector.load %arg3[%c0_2, %c0_3, %c0_4] : memref<1x8x32xf32, #tpu.memory_space<vmem>>, vector<1x8x32xf32>
    %3 = vector.shape_cast %2 : vector<1x8x32xf32> to vector<8x32xf32>
    %c0_5 = arith.constant 0 : index
    %c0_6 = arith.constant 0 : index
    %c0_7 = arith.constant 0 : index
    %4 = vector.load %arg4[%c0_5, %c0_6, %c0_7] : memref<1x8x32xf32, #tpu.memory_space<vmem>>, vector<1x8x32xf32>
    %5 = vector.shape_cast %4 : vector<1x8x32xf32> to vector<8x32xf32>
    %cst = arith.constant 0.0883883461 : f32
    %6 = vector.broadcast %cst : f32 to vector<8x32xf32>
    %7 = arith.mulf %1, %6 : vector<8x32xf32>
    %cst_8 = arith.constant dense<0.000000e+00> : vector<8x8xf32>
    %8 = tpu.matmul %7, %3, %cst_8 {dimension_numbers = #tpu.dot_dimension_numbers<[1], [1], [0], [0], [0, 0, 1, 0], [], []>} : vector<8x32xf32>, vector<8x32xf32>, vector<8x8xf32> -> vector<8x8xf32>
    %cst_9 = arith.constant dense<0xFF800000> : vector<8xf32>
    %9 = vector.multi_reduction <maximumf>, %8, %cst_9 [1] : vector<8x8xf32> to vector<8xf32>
    %10 = vector.shape_cast %9 : vector<8xf32> to vector<8x1xf32>
    %11 = vector.broadcast %10 : vector<8x1xf32> to vector<8x8xf32>
    %12 = arith.subf %8, %11 : vector<8x8xf32>
    %13 = math.exp %12 : vector<8x8xf32>
    %cst_10 = arith.constant dense<0.000000e+00> : vector<8xf32>
    %14 = vector.multi_reduction <add>, %13, %cst_10 [1] : vector<8x8xf32> to vector<8xf32>
    %15 = vector.shape_cast %14 : vector<8xf32> to vector<8x1xf32>
    %cst_11 = arith.constant dense<0.000000e+00> : vector<8x32xf32>
    %16 = tpu.matmul %13, %5, %cst_11 {dimension_numbers = #tpu.dot_dimension_numbers<[1], [0], [0], [1], [0, 0, 1, 1], [], []>} : vector<8x8xf32>, vector<8x32xf32>, vector<8x32xf32> -> vector<8x32xf32>
    %17 = tpu.reciprocal %15 {approx = true} : vector<8x1xf32> -> vector<8x1xf32>
    %18 = vector.broadcast %17 : vector<8x1xf32> to vector<8x32xf32>
    %19 = arith.mulf %16, %18 : vector<8x32xf32>
    %c0_12 = arith.constant 0 : index
    %c0_13 = arith.constant 0 : index
    %c0_14 = arith.constant 0 : index
    %20 = vector.load %arg5[%c0_12, %c0_13, %c0_14] : memref<1x8x32xf32, #tpu.memory_space<vmem>>, vector<1x8x32xf32>
    %21 = vector.shape_cast %20 : vector<1x8x32xf32> to vector<8x32xf32>
    %22 = vector.shape_cast %19 : vector<8x32xf32> to vector<1x8x32xf32>
    tpu.vector_store %arg5[%c0_12, %c0_13, %c0_14], %22 {strides = array<i32>} : memref<1x8x32xf32, #tpu.memory_space<vmem>>, vector<1x8x32xf32>,
    return
  }
  func.func @transform_0(%arg0: i32, %arg1: i32) -> (i32, i32, i32) {
    %c0_i32 = arith.constant 0 : i32
    %c0_i32_0 = arith.constant 0 : i32
    return %arg0, %arg1, %c0_i32 : i32, i32, i32
  }
  func.func @transform_1(%arg0: i32, %arg1: i32) -> (i32, i32, i32) {
    %c0_i32 = arith.constant 0 : i32
    %c0_i32_0 = arith.constant 0 : i32
    %c0_i32_1 = arith.constant 0 : i32
    return %arg0, %c0_i32, %c0_i32_0 : i32, i32, i32
  }
  func.func @transform_2(%arg0: i32, %arg1: i32) -> (i32, i32, i32) {
    %c0_i32 = arith.constant 0 : i32
    %c0_i32_0 = arith.constant 0 : i32
    %c0_i32_1 = arith.constant 0 : i32
    return %arg0, %c0_i32, %c0_i32_0 : i32, i32, i32
  }
  func.func @transform_3(%arg0: i32, %arg1: i32) -> (i32, i32, i32) {
    %c0_i32 = arith.constant 0 : i32
    %c0_i32_0 = arith.constant 0 : i32
    return %arg0, %arg1, %c0_i32 : i32, i32, i32
  }
}

</mosaic_0001>

<bundles_post_ra>
// kernel: tpu_custom_call.1
= control target key start
LH: loop header
LB: loop body
LE: loop exit
PB: predicated region body
PF: predicated region fallthrough
CT: control target
= control target key end

     0   :  { %s944_s0 = inlined_call_operand.hbm [shape: f32[2,8,32], index: 0, kind: input, shape index: {}]   ;;  %s945_s1 = inlined_call_operand.hbm [shape: f32[2,8,32], index: 1, kind: input, shape index: {}]   ;;  %s946_s2 = inlined_call_operand.hbm [shape: f32[2,8,32], index: 2, kind: input, shape index: {}]   ;;  %s947_s3 = inlined_call_operand.hbm [shape: f32[2,8,32], index: 3, kind: output, shape index: {}]  }
   0x1   :  { %950 = sst [smem:[#allocation15_spill]] %s945_s1 }
   0x2   :  { %8 = vsyncpa [#allocation3], 0 }
   0x3   :  { %10 = vsyncpa [#allocation3 + $0x1], 0 }
   0x4   :  { %11 = vsyncpa [#allocation6], 0 }
   0x5   :  { %13 = vsyncpa [#allocation6 + $0x1], 0 }
   0x6   :  { %14 = vsyncpa [#allocation4], 0 }
   0x7   :  { %16 = vsyncpa [#allocation4 + $0x1], 0  ;;  %s783_s12 = smov 0   ;;  %s785_s13 = smov 0  }
   0x8   :  { %s787_s14 = smov 0   ;;  %s789_s15 = smov 0  }
   0x9   :  { %s791_s16 = smov 0   ;;  %s793_s17 = smov 0  }
   0xa LB: > { %951 = sst [smem:[#allocation12_spill]] %s757_s16  ;;  %s814_s18 = sadd.s32 4294967295, %s761_s17   ;;  %s761_s17 = sphi %s793_s17, %s22_s17   ;;  %s757_s16 = sphi %s791_s16, %s963_s16   ;;  %s753_s15 = sphi %s789_s15, %s962_s15   ;;  %s749_s14 = sphi %s787_s14, %s966_s14   ;;  %s745_s13 = sphi %s785_s13, %s965_s13   ;;  %s741_s12 = sphi %s783_s12, %s964_s12  }
   0xb   : > { %s488_s19 = sadd.s32 4294967294, %s761_s17   ;;  %s34_s20 = sadd.s32 1, %s757_s16 }
   0xc   : > { %s43_s21 = sadd.s32 1, %s749_s14  ;;  %p36_p0 = scmp.ge.s32.totalorder %s34_s20, 2 }
   0xd   : > { %p50_p1 = scmp.ne.s32.totalorder %s749_s14, %s745_s13  ;;  %p51_p2 = scmp.eq.s32.totalorder %s761_s17, 0 }
   0xe   : > { %p56_p3 = scmp.ne.s32.totalorder %s745_s13, %s741_s12  ;;  %s968_s20 = smov (%p36_p0, %s34_s20), 0 }
   0xf   : > { %952 = sst [smem:[#allocation13_spill]] %s968_s20  ;;  %p826_p4 = por %p51_p2, %p50_p1 }
  0x10   : > { %p57_p5 = scmp.eq.s32.totalorder %s814_s18, 0  ;;  %s38_s23 = ssub.s32 %s757_s16, %s968_s20 }
  0x11   : > { %p134_p6 = scmp.eq.s32.totalorder %s814_s18, 1  ;;  %p41_p7 = scmp.eq.s32.totalorder %s38_s23, 0 }
  0x12   : > { %p834_p8 = por %p57_p5, %p56_p3  ;;  %p140_p10 = scmp.eq.s32.totalorder %s488_s19, 1 }
  0x13   : > { %p838_p9 = por %p134_p6, %p50_p1  ;;  %p490_p12 = scmp.ge.s32.totalorder %s761_s17, 2 }
  0x14   : > { %s843_s26 = scalar_select %p41_p7, %s749_s14, %s43_s21  }
  0x15   : > { %p845_p11 = por %p140_p10, %p56_p3  ;;  %p531_p13 = scmp.lt.s32.totalorder %s761_s17, 2 }
  0x16   : > { %956 = sst [smem:[#allocation14_spill]] %s843_s26  ;;  %s160_s28 = sand.u32 1, %s749_s14  }
  0x17   : > { %s491_s29 = sshll.u32 %s160_s28, 3  ;;  %s492_s30 = sshll.u32 %s757_s16, 3 }
  0x18   : > { %p855_p0 = pnand %p531_p13, %p826_p4  ;;  %s180_s5 = sand.u32 1, %s761_s17  }
  0x19   : > { %s959_s1 = sld [smem:[#allocation15_spill]]  ;;  %s184_s10 = scalar_lea.vmem [#allocation5], %s491_s29 }
  0x1a   : > { %s192_s11 = sshll.u32 %s184_s10, 4  ;;  %s181_s19 = scalar_lea.sflag [#allocation6], %s180_s5  ;;  %s193_s11 = int_to_ptr.vmem [resolvable:$true] %s192_s11 }
  0x1b   : > { %p497_p1 = scmp.ge.s32.totalorder %s761_s17, 1  ;;  %p216_p2 = scmp.lt.s32.totalorder %s761_s17, 3 }
  0x1c   : > { %s169_s6 = scalar_lea.hbm %s944_s0, %s492_s30  ;;  %s161_s10 = scalar_lea.sflag [#allocation3], %s160_s28 }
  0x1d   : > { %p867_p3 = pnand %p497_p1, %p216_p2  ;;  %s171_s7 = sshll.u32 %s169_s6, 4  ;;  %s172_s7 = int_to_ptr.hbm [resolvable:$true] %s171_s7 }
  0x1e   : > { %s203_s16 = scalar_lea.vmem [#allocation7], %s491_s29  ;;  %s884_s22 = sand.u32 (!%p867_p3), 1, %s745_s13  }
  0x1f   : > { %s188_s8 = scalar_lea.hbm %s959_s1, %s492_s30  ;;  %s211_s26 = sshll.u32 %s203_s16, 4  ;;  %s212_s26 = int_to_ptr.vmem [resolvable:$true] %s211_s26 }
  0x20   : > { %s190_s9 = sshll.u32 %s188_s8, 4  ;;  %s164_s8 = scalar_lea.vmem [#allocation2], %s491_s29  ;;  %s191_s9 = int_to_ptr.hbm [resolvable:$true] %s190_s9 }
  0x21   : > { %523 = dma.hbm_to_vmem [thread:$0]  (!%p855_p0), %s191_s9, 128, %s193_s11, %s181_s19  }
  0x22   : > { %s173_s1 = sshll.u32 %s164_s8, 4  ;;  %s207_s11 = scalar_lea.hbm %s946_s2, %s492_s30  ;;  %s174_s1 = int_to_ptr.vmem [resolvable:$true] %s173_s1 }
  0x23   : > { %520 = dma.hbm_to_vmem [thread:$0]  (!%p855_p0), %s172_s7, 128, %s174_s1, %s161_s10  }
  0x24   : > { %s209_s20 = sshll.u32 %s207_s11, 4  ;;  %220 = sbr.rel (%p867_p3) target bundleno = 434 (0x1b2), region = 32  ;;  %s210_s20 = int_to_ptr.hbm [resolvable:$true] %s209_s20 }
  0x25   : > { %526 = dma.hbm_to_vmem [thread:$0]  (!%p855_p0), %s210_s20, 128, %s212_s26, %s181_s19  }
  0x26   : > { %s887_s1 = sshll.u32 (!%p867_p3), %s884_s22, 3  ;;  %s223_s28 = scalar_lea.sflag (!%p867_p3), [#allocation3], %s884_s22 }
  0x27   : > { %s226_s30 = scalar_lea.vmem (!%p867_p3), [#allocation2], %s887_s1 }
  0x29   : > { %728 = dma.done.wait (%p834_p8), %s223_s28, 128  }
  0x2a   : > { %730 = vsyncadd (%p834_p8), %s223_s28, 4294967168  ;;  %s232_s16 = sand.u32 1, %s814_s18   ;;  %s236_s26 = scalar_lea.vmem [#allocation5], %s887_s1 }
  0x2b   : > { %s233_s20 = scalar_lea.sflag [#allocation6], %s232_s16 }
  0x2c   : > { %732 = dma.done.wait (%p834_p8), %s233_s20, 256  }
  0x2d   : > { %734 = vsyncadd (%p834_p8), %s233_s20, 4294967040  ;;  %vm284_vm0 = vcmask 261120   ;;  %v281_v0 = vld [vmem:[%s236_s26] sm:$0xff]  ;;  %v280_v1 = vld [vmem:[%s226_s30] sm:$0xff]  ;;  %vm311_vm1 = vcmask 64512   ;;  %s246_s18 = scalar_lea.vmem [#allocation7], %s887_s1 }
  0x2e   : > { %502 = vmatpush.xpose.msk.msra.mxu0 %vm284_vm0, %v281_v0  ;;  %v283_v2 = vmul.f32 0.088388346, %v280_v1  ;;  %v282_v5 = vld [vmem:[%s246_s18] sm:$0xff]  ;;  %s506_s24 = sshll.u32 %s753_s15, 3  ;;  %s279_s21 = scalar_lea.vmem [#allocation8], %s887_s1 }
  0x2f   : > { %339 = vmatpush.msra.mxu1 %v282_v5  ;;  %s359_s19 = scalar_lea.hbm %s947_s3, %s506_s24  ;;  %s361_s23 = sshll.u32 %s279_s21, 4  ;;  %s362_s23 = int_to_ptr.vmem [resolvable:$true] %s361_s23 }
  0x30   : > { %s363_s6 = sshll.u32 %s359_s19, 4  ;;  %s348_s7 = scalar_lea.sflag [#allocation4], %s884_s22  ;;  %s364_s6 = int_to_ptr.hbm [resolvable:$true] %s363_s6 }
  0x31   : > { %503 = vmatmul.msk.f32.vlgmr.msra.gmra.mxu0 %vm284_vm0, %v283_v2  ;;  %s689_s8 = sshra.s32 %s364_s6, 4  ;;  %s695_s9 = scalar_lea.hbm %s947_s3, 16  ;;  %s690_s8 = int_to_ptr.hbm [resolvable:$true] %s689_s8 }
  0x32   : > { %s691_s15 = scalar_lea.hbm %s690_s8, 8  ;;  %p696_p7 = scmp.lt.s32.totalorder %s690_s8, %s947_s3 }
  0x33   : > { %p692_p4 = scmp.ne.s32.totalorder %s690_s8, %s691_s15  ;;  %p697_p8 = scmp.lt.s32.totalorder %s695_s9, %s691_s15 }
  0x35   : > { %p693_p5 = pnand %p692_p4, %p838_p9  ;;  %p698_p10 = por %p697_p8, %p696_p7 }
  0x37   : > { %p694_p6 = pneg %p693_p5 }
  0x39   : > { %p699_p13 = pnand %p698_p10, %p694_p6 }
  0xae   : > { %v308_v3 = vpop.f32.mrf.mxu0 }
  0xaf   : > { %v312_v4 = vsel %vm311_vm1, %v308_v3, -inf }
  0xb0   : > { %313 = vmax.xlane.f32.xlu0 %v312_v4 }
 0x123   : > { %v314_v6 = vpop.xlane.xlu0 %313 }
 0x124   : > { %v315_v7 = vsub.f32 %v308_v3, %v314_v6 }
 0x126   : > { %v316_v8 = vmul.f32 1.442695, %v315_v7 }
 0x128   : > { %581 = vpow2.f32 %v316_v8 }
 0x12e   : > { %v582_v9 = vpop.eup %581 }
 0x12f   : > { %504 = vmatmul.msk.f32.vlgmr.msra.gmra.mxu1 %vm311_vm1, %v582_v9  ;;  %v318_v10 = vsel %vm311_vm1, %v582_v9, 0.0 }
 0x130   : > { %319 = vadd.xlane.f32.xlu0 %v318_v10 }
 0x1a3   : > { %v320_v11 = vpop.xlane.xlu0 %319 }
 0x1a4   : > { %583 = vrcp.f32 %v320_v11 }
 0x1aa   : > { %v584_v12 = vpop.eup %583 }
 0x1ac   : > { %v341_v13 = vpop.f32.mrf.mxu1 }
 0x1ad   : > { %v345_v14 = vmul.f32 %v584_v12, %v341_v13 }
 0x1af   : > { %346 = vst.msk [vmem:[%s279_s21] sm:$0xff] %vm284_vm0, %v345_v14 }
 0x1b0   : > { %702 = shalt.err (!%p699_p13)
}
 0x1b1   : > { %515 = dma.vmem_to_hbm [thread:$0]  (%p838_p9), %s362_s23, 128, %s364_s6, %s348_s7  }
 0x1b2 PF: > { %s375_s22 = sand.u32 1, %s741_s12   ;;  %p528_p0 = pnand %p490_p12, %p845_p11 }
 0x1b3   : > { %s376_s28 = scalar_lea.sflag [#allocation4], %s375_s22 }
 0x1b4   : > { %p529_p1 = pneg %p528_p0 }
 0x1b6   : > { %736 = dma.done.wait (%p529_p1), %s376_s28, 128  }
 0x1b7   : > { %738 = vsyncadd (%p529_p1), %s376_s28, 4294967168  ;;  %s22_s17 = sadd.s32 1, %s761_s17   ;;  %s961_s30 = sld [smem:[#allocation14_spill]] }
 0x1b8   : > { %p19_p2 = scmp.ge.s32.totalorder %s22_s17, 4   ;;  %s962_s15 = sld [smem:[#allocation12_spill]] }
 0x1b9   : > { %s963_s16 = sld [smem:[#allocation13_spill]]  ;;  %s964_s12 = smov %s745_s13 }
 0x1ba   : > { %s965_s13 = smov %s749_s14  ;;  %21 = sbr.rel (!%p19_p2) target bundleno = 10 (0xa), region = 101 }
 0x1bd   : > { %s966_s14 = smov %s961_s30 }
 0x1bf   :  { %382 = vsyncpa [#allocation3], 1 }
 0x1c0   :  { %384 = vsyncpa [#allocation3 + $0x1], 1 }
 0x1c1   :  { %385 = vsyncpa [#allocation6], 1 }
 0x1c2   :  { %387 = vsyncpa [#allocation6 + $0x1], 1 }
 0x1c3   :  { %388 = vsyncpa [#allocation4], 1 }
 0x1c4   :  { %390 = vsyncpa [#allocation4 + $0x1], 1 }

</bundles_post_ra>
